<compile_context>
chip_gen: v6e
topology: v6e:2x2x1
jax: 0.10.0
libtpu: 0.0.40
codegen_flags: <defaults>
</compile_context>

<pallas_src>
import jax
import jax.numpy as jnp
from jax.experimental import pallas as pl
from jax.experimental.pallas import tpu as pltpu

N_GATES = 3


def _round_up(x, m):
    return ((x + m - 1) // m) * m


# ----------------------------------------------------------------------------
# Pallas kernel: one grid step = one chunk of TB timesteps.
# Slab lane layout per row: [f | i | o | c | h | a | pad]  (width multiple of 128)
# ----------------------------------------------------------------------------
def _crplstm_chunk_kernel(x_ref,                 # (TB, D_in)    chunk of inputs
                          h0_ref, c0_ref,        # (1, H)        initial state
                          wi_ref, wh_ref, b_ref, # (D_in,4H), (H,4H), (1,4H)
                          wo_ref, bo_ref,        # (H,D_out), (1,D_out)
                          slab_ref,              # (TB, W_slab)  output slab
                          xw_s,                  # (TB, 4H) scratch: X@Wi + b
                          h_all_s,               # (TB, H)  scratch: h rows
                          h_s, c_s):             # (1, H)   cross-chunk state
    H = wh_ref.shape[0]
    TB = x_ref.shape[0]
    D_out = wo_ref.shape[1]
    G = N_GATES * H                              # 3H

    chunk = pl.program_id(0)

    @pl.when(chunk == 0)
    def _():
        h_s[...] = h0_ref[...]
        c_s[...] = c0_ref[...]

    # Prologue: x-side contribution + bias for the whole chunk, ONE MXU matmul.
    xw_s[...] = (jnp.dot(x_ref[...], wi_ref[...],
                         preferred_element_type=jnp.float32) + b_ref[...])

    wh = wh_ref[...]                              # hoist resident weight load

    def step(t, carry):
        h, c = carry
        # serial per-step work: only the h-recurrence matmul (K = H)
        preact = (jnp.dot(h, wh, preferred_element_type=jnp.float32)
                  + xw_s[pl.ds(t, 1), :])
        gates = jax.nn.sigmoid(preact[:, :G])     # [f | i | o]
        c_new = jnp.tanh(preact[:, G:])
        f_t = gates[:, :H]
        i_t = gates[:, H:2 * H]
        o_t = gates[:, 2 * H:]
        c = f_t * c + i_t * c_new
        h = o_t * jnp.tanh(c)
        # single lane-dense per-step store: [f|i|o|c] is exactly 4H lanes
        slab_ref[pl.ds(t, 1), pl.ds(0, 4 * H)] = jnp.concatenate(
            [gates, c], axis=-1)
        h_all_s[pl.ds(t, 1), :] = h
        return (h, c)

    h, c = jax.lax.fori_loop(0, TB, step, (h_s[...], c_s[...]),
                             unroll=(TB <= 32))

    # carry state to the next chunk
    h_s[...] = h
    c_s[...] = c

    # Epilogue: bulk-write h rows and the hoisted continuous output head.
    h_all = h_all_s[...]
    slab_ref[:, pl.ds(4 * H, H)] = h_all
    slab_ref[:, pl.ds(5 * H, D_out)] = (
        jnp.dot(h_all, wo_ref[...], preferred_element_type=jnp.float32)
        + bo_ref[...])


# ----------------------------------------------------------------------------
# Sequence wrapper: whole recurrence in ONE pallas_call, gridded over chunks.
# ----------------------------------------------------------------------------
@jax.jit
def crplstm_sequence(xs, h0, c0, params):
    """xs: (T, 1, D_in); h0/c0: (1, 1, H).
    Returns per-step (a, h, c, f, i, o), each (T, feature)."""
    wi, wh, b = params["wi"], params["wh"], params["b"]
    wo, bo = params["wo"], params["bo"]
    T, _, D_in = xs.shape
    H = wh.shape[0]
    D_out = wo.shape[1]

    TB = min(128, _round_up(T, 8))                 # timesteps per grid step
    T_pad = _round_up(T, TB)
    NC = T_pad // TB
    W_slab = _round_up(5 * H + D_out, 128)         # lane-dense slab width

    x2 = xs.reshape(T, D_in).astype(jnp.float32)
    if T_pad != T:
        x2 = jnp.pad(x2, ((0, T_pad - T), (0, 0)))   # trailing pad, discarded
    h0_2d = h0.reshape(1, H).astype(jnp.float32)
    c0_2d = c0.reshape(1, H).astype(jnp.float32)

    const = lambda cb: (0, 0)   # resident blocks (weights, biases, init state)
    # TODO(synk): for large H on v7x (64 MiB VMEM), use bf16 weights and/or
    # pipeline_mode=pl.Buffered(1) on the constant-index weight specs.

    slab = pl.pallas_call(
        _crplstm_chunk_kernel,
        out_shape=jax.ShapeDtypeStruct((T_pad, W_slab), jnp.float32),
        grid_spec=pltpu.PrefetchScalarGridSpec(
            num_scalar_prefetch=0,
            grid=(NC,),
            in_specs=[
                pl.BlockSpec((TB, D_in), lambda cb: (cb, 0)),   # x chunk
                pl.BlockSpec((1, H), const),                    # h0
                pl.BlockSpec((1, H), const),                    # c0
                pl.BlockSpec(wi.shape, const),                  # Wi
                pl.BlockSpec(wh.shape, const),                  # Wh
                pl.BlockSpec(b.shape, const),                   # b (bi + bh)
                pl.BlockSpec(wo.shape, const),                  # Wo
                pl.BlockSpec(bo.shape, const),                  # bo
            ],
            out_specs=pl.BlockSpec((TB, W_slab), lambda cb: (cb, 0)),
            scratch_shapes=[
                pltpu.VMEM((TB, (N_GATES + 1) * H), jnp.float32),  # xw_s
                pltpu.VMEM((TB, H), jnp.float32),                  # h_all_s
                pltpu.VMEM((1, H), jnp.float32),                   # h_s
                pltpu.VMEM((1, H), jnp.float32),                   # c_s
            ],
        ),
        compiler_params=pltpu.CompilerParams(
            # strict sequential recurrence across chunks
            dimension_semantics=("arbitrary",)),
    )(x2, h0_2d, c0_2d, wi, wh, b, wo, bo)

    s = slab[:T]
    f_t = s[:, :H]
    i_t = s[:, H:2 * H]
    o_t = s[:, 2 * H:3 * H]
    c_t = s[:, 3 * H:4 * H]
    h_t = s[:, 4 * H:5 * H]
    a_t = s[:, 5 * H:5 * H + D_out]
    return a_t, h_t, c_t, f_t, i_t, o_t


# ----------------------------------------------------------------------------
# Single-step wrapper mirroring CRPLSTM.forward
# (output_format='continuous', use_ctx=False, batch=1 as in the module)
# ----------------------------------------------------------------------------
def crplstm_forward(x_t, h, c, params):
    D_in = params["wi"].shape[0]
    a, hs, cs, f, i, o = crplstm_sequence(
        x_t.reshape(1, 1, D_in), h, c, params)
    prob_a_t, v_t = None, None
    # TODO(synk): 'discrete' head (A2C_linear + pick_action) and the use_ctx
    # context projection live outside this file; only the 'continuous' h2o
    # head is implemented here.
    h_t = hs.reshape(1, 1, -1)
    c_t = cs.reshape(1, 1, -1)
    output = (a, prob_a_t, v_t, (h_t, c_t))
    cache = (f, i, o)
    return output, cache


# ----------------------------------------------------------------------------
# Deterministic parameter init (orthogonal weights, zero biases) — mirrors
# reset_parameter(); bi + bh are pre-summed once here, outside the kernel.
# ----------------------------------------------------------------------------
def init_params(key, input_dim, hidden_dim, output_dim):
    n_preact = (N_GATES + 1) * hidden_dim
    orth = jax.nn.initializers.orthogonal()
    k1, k2, k3 = jax.random.split(key, 3)
    # Init in PyTorch (out, in) layout, then transpose to kernel (in, out).
    w_i2h = orth(k1, (n_preact, input_dim), jnp.float32).T
    w_h2h = orth(k2, (n_preact, hidden_dim), jnp.float32).T
    w_h2o = orth(k3, (output_dim, hidden_dim), jnp.float32).T
    b_i2h = jnp.zeros((1, n_preact), jnp.float32)
    b_h2h = jnp.zeros((1, n_preact), jnp.float32)
    return {
        "wi": w_i2h,                               # (D_in, 4H)
        "wh": w_h2h,                               # (H, 4H)
        "b": b_i2h + b_h2h,                        # (1, 4H)
        "wo": w_h2o,                               # (H, D_out)
        "bo": jnp.zeros((1, output_dim), jnp.float32),
    }


# Pure-JAX reference of the same recurrence, for a sanity check.
def _reference_seq(xs, h0, c0, p):
    H = p["wh"].shape[0]
    wi, wh = p["wi"], p["wh"]

    def step(carry, x):
        h, c = carry
        preact = x.reshape(1, -1) @ wi + h @ wh + p["b"]
        gates = jax.nn.sigmoid(preact[:, :N_GATES * H])
        f, i, o = gates[:, :H], gates[:, H:2 * H], gates[:, 2 * H:]
        c_new = jnp.tanh(preact[:, N_GATES * H:])
        c = f * c + i * c_new
        h = o * jnp.tanh(c)
        a = h @ p["wo"] + p["bo"]
        return (h, c), (a[0], h[0], c[0], f[0], i[0], o[0])

    (_, _), outs = jax.lax.scan(
        step, (h0.reshape(1, H), c0.reshape(1, H)), xs)
    return outs  # tuple of (T, feature) arrays


if __name__ == "__main__":
    input_dim, hidden_dim, output_dim = 16, 32, 8
    T = 8

    key = jax.random.PRNGKey(0)
    kp, kx, kh, kc = jax.random.split(key, 4)
    params = init_params(kp, input_dim, hidden_dim, output_dim)

    xs = jax.random.normal(kx, (T, 1, input_dim), jnp.float32)
    h0 = jax.random.normal(kh, (1, 1, hidden_dim), jnp.float32)
    c0 = jax.random.normal(kc, (1, 1, hidden_dim), jnp.float32)

    # whole-sequence fused kernel
    a_t, h_t, c_t, f_t, i_t, o_t = crplstm_sequence(xs, h0, c0, params)
    jax.block_until_ready((a_t, h_t, c_t, f_t, i_t, o_t))

    # sanity check vs. pure-JAX scan reference
    ra, rh, rc, rf, ri, ro = _reference_seq(xs, h0, c0, params)
    assert jnp.allclose(a_t, ra, atol=1e-4), jnp.max(jnp.abs(a_t - ra))
    assert jnp.allclose(h_t, rh, atol=1e-4)
    assert jnp.allclose(c_t, rc, atol=1e-4)
    assert jnp.allclose(f_t, rf, atol=1e-4)
    assert jnp.allclose(i_t, ri, atol=1e-4)
    assert jnp.allclose(o_t, ro, atol=1e-4)

    # single-step module-style call (matches CRPLSTM.forward signature/output)
    (a1, prob_a1, v1, (h1, c1)), (f1, i1, o1) = crplstm_forward(
        xs[0], h0, c0, params)
    jax.block_until_ready((a1, h1, c1))
    assert a1.shape == (1, output_dim)
    assert h1.shape == (1, 1, hidden_dim) and c1.shape == (1, 1, hidden_dim)
    assert jnp.allclose(a1[0], ra[0], atol=1e-4)
    assert jnp.allclose(h1.reshape(-1), rh[0], atol=1e-4)
    assert jnp.allclose(c1.reshape(-1), rc[0], atol=1e-4)

    print("KERNEL_OK")
</pallas_src>

<mosaic_0001>
module attributes {stable_mosaic.version = 11 : i64} {
  func.func @_crplstm_chunk_kernel(%arg0: i32, %arg1: memref<8x16xf32, #tpu.memory_space<vmem>>, %arg2: memref<1x32xf32, #tpu.memory_space<vmem>>, %arg3: memref<1x32xf32, #tpu.memory_space<vmem>>, %arg4: memref<16x128xf32, #tpu.memory_space<vmem>>, %arg5: memref<32x128xf32, #tpu.memory_space<vmem>>, %arg6: memref<1x128xf32, #tpu.memory_space<vmem>>, %arg7: memref<32x8xf32, #tpu.memory_space<vmem>>, %arg8: memref<1x8xf32, #tpu.memory_space<vmem>>, %arg9: memref<8x256xf32, #tpu.memory_space<vmem>>, %arg10: memref<8x128xf32, #tpu.memory_space<vmem>>, %arg11: memref<8x32xf32, #tpu.memory_space<vmem>>, %arg12: memref<1x32xf32, #tpu.memory_space<vmem>>, %arg13: memref<1x32xf32, #tpu.memory_space<vmem>>) attributes {dimension_semantics = [#tpu.dimension_semantics<arbitrary>], iteration_bounds = array<i64: 1>, scalar_prefetch = 0 : i64, scratch_operands = 4 : i64, tpu.core_type = #tpu.core_type<tc>, window_params = [{transform_indices = @transform_0, window_bounds = array<i64: 8, 16>}, {pipeline_mode = #tpu.pipeline_mode<synchronous>, transform_indices = @transform_1, window_bounds = array<i64: 1, 32>}, {pipeline_mode = #tpu.pipeline_mode<synchronous>, transform_indices = @transform_2, window_bounds = array<i64: 1, 32>}, {pipeline_mode = #tpu.pipeline_mode<synchronous>, transform_indices = @transform_3, window_bounds = array<i64: 16, 128>}, {pipeline_mode = #tpu.pipeline_mode<synchronous>, transform_indices = @transform_4, window_bounds = array<i64: 32, 128>}, {pipeline_mode = #tpu.pipeline_mode<synchronous>, transform_indices = @transform_5, window_bounds = array<i64: 1, 128>}, {pipeline_mode = #tpu.pipeline_mode<synchronous>, transform_indices = @transform_6, window_bounds = array<i64: 32, 8>}, {pipeline_mode = #tpu.pipeline_mode<synchronous>, transform_indices = @transform_7, window_bounds = array<i64: 1, 8>}, {transform_indices = @transform_8, window_bounds = array<i64: 8, 256>}]} {
    %c0_i32 = arith.constant 0 : i32
    %0 = arith.cmpi eq, %arg0, %c0_i32 : i32
    %1 = arith.extui %0 : i1 to i32
    %c0_i32_0 = arith.constant 0 : i32
    %2 = arith.cmpi ne, %1, %c0_i32_0 : i32
    scf.if %2 {
      %c0_68 = arith.constant 0 : index
      %c0_69 = arith.constant 0 : index
      %223 = vector.load %arg2[%c0_68, %c0_69] : memref<1x32xf32, #tpu.memory_space<vmem>>, vector<1x32xf32>
      %c0_70 = arith.constant 0 : index
      %c0_71 = arith.constant 0 : index
      %224 = vector.load %arg12[%c0_70, %c0_71] : memref<1x32xf32, #tpu.memory_space<vmem>>, vector<1x32xf32>
      tpu.vector_store %arg12[%c0_70, %c0_71], %223 {strides = array<i32>} : memref<1x32xf32, #tpu.memory_space<vmem>>, vector<1x32xf32>,
      %c0_72 = arith.constant 0 : index
      %c0_73 = arith.constant 0 : index
      %225 = vector.load %arg3[%c0_72, %c0_73] : memref<1x32xf32, #tpu.memory_space<vmem>>, vector<1x32xf32>
      %c0_74 = arith.constant 0 : index
      %c0_75 = arith.constant 0 : index
      %226 = vector.load %arg13[%c0_74, %c0_75] : memref<1x32xf32, #tpu.memory_space<vmem>>, vector<1x32xf32>
      tpu.vector_store %arg13[%c0_74, %c0_75], %225 {strides = array<i32>} : memref<1x32xf32, #tpu.memory_space<vmem>>, vector<1x32xf32>,
    } else {
    }
    %c0 = arith.constant 0 : index
    %c0_1 = arith.constant 0 : index
    %3 = vector.load %arg1[%c0, %c0_1] : memref<8x16xf32, #tpu.memory_space<vmem>>, vector<8x16xf32>
    %c0_2 = arith.constant 0 : index
    %c0_3 = arith.constant 0 : index
    %4 = vector.load %arg4[%c0_2, %c0_3] : memref<16x128xf32, #tpu.memory_space<vmem>>, vector<16x128xf32>
    %cst = arith.constant dense<0.000000e+00> : vector<8x128xf32>
    %5 = tpu.matmul %3, %4, %cst {dimension_numbers = #tpu.dot_dimension_numbers<[1], [0], [0], [1], [0, 0, 1, 1], [], []>} : vector<8x16xf32>, vector<16x128xf32>, vector<8x128xf32> -> vector<8x128xf32>
    %c0_4 = arith.constant 0 : index
    %c0_5 = arith.constant 0 : index
    %6 = vector.load %arg6[%c0_4, %c0_5] : memref<1x128xf32, #tpu.memory_space<vmem>>, vector<1x128xf32>
    %7 = vector.broadcast %6 : vector<1x128xf32> to vector<8x128xf32>
    %8 = arith.addf %5, %7 : vector<8x128xf32>
    %c0_6 = arith.constant 0 : index
    %c0_7 = arith.constant 0 : index
    %9 = vector.load %arg10[%c0_6, %c0_7] : memref<8x128xf32, #tpu.memory_space<vmem>>, vector<8x128xf32>
    tpu.vector_store %arg10[%c0_6, %c0_7], %8 {strides = array<i32>} : memref<8x128xf32, #tpu.memory_space<vmem>>, vector<8x128xf32>,
    %c0_8 = arith.constant 0 : index
    %c0_9 = arith.constant 0 : index
    %10 = vector.load %arg5[%c0_8, %c0_9] : memref<32x128xf32, #tpu.memory_space<vmem>>, vector<32x128xf32>
    %c0_10 = arith.constant 0 : index
    %c0_11 = arith.constant 0 : index
    %11 = vector.load %arg12[%c0_10, %c0_11] : memref<1x32xf32, #tpu.memory_space<vmem>>, vector<1x32xf32>
    %c0_12 = arith.constant 0 : index
    %c0_13 = arith.constant 0 : index
    %12 = vector.load %arg13[%c0_12, %c0_13] : memref<1x32xf32, #tpu.memory_space<vmem>>, vector<1x32xf32>
    %c0_i32_14 = arith.constant 0 : i32
    %cst_15 = arith.constant dense<0.000000e+00> : vector<1x128xf32>
    %13 = tpu.matmul %11, %10, %cst_15 {dimension_numbers = #tpu.dot_dimension_numbers<[1], [0], [0], [1], [0, 0, 1, 1], [], []>} : vector<1x32xf32>, vector<32x128xf32>, vector<1x128xf32> -> vector<1x128xf32>
    %14 = arith.index_cast %c0_i32_14 : i32 to index
    %c0_16 = arith.constant 0 : index
    %15 = vector.load %arg10[%14, %c0_16] : memref<8x128xf32, #tpu.memory_space<vmem>>, vector<1x128xf32>
    %16 = arith.addf %13, %15 : vector<1x128xf32>
    %17 = vector.extract_strided_slice %16 {offsets = [0, 0], sizes = [1, 96], strides = [1, 1]} : vector<1x128xf32> to vector<1x96xf32>
    %18 = arith.negf %17 : vector<1x96xf32>
    %19 = math.exp %18 : vector<1x96xf32>
    %cst_17 = arith.constant 1.000000e+00 : f32
    %20 = vector.broadcast %cst_17 : f32 to vector<1x96xf32>
    %21 = arith.addf %20, %19 : vector<1x96xf32>
    %22 = arith.divf %20, %21 : vector<1x96xf32>
    %23 = vector.extract_strided_slice %16 {offsets = [0, 96], sizes = [1, 32], strides = [1, 1]} : vector<1x128xf32> to vector<1x32xf32>
    %24 = math.tanh %23 : vector<1x32xf32>
    %25 = vector.extract_strided_slice %22 {offsets = [0, 0], sizes = [1, 32], strides = [1, 1]} : vector<1x96xf32> to vector<1x32xf32>
    %26 = vector.extract_strided_slice %22 {offsets = [0, 32], sizes = [1, 32], strides = [1, 1]} : vector<1x96xf32> to vector<1x32xf32>
    %27 = vector.extract_strided_slice %22 {offsets = [0, 64], sizes = [1, 32], strides = [1, 1]} : vector<1x96xf32> to vector<1x32xf32>
    %28 = arith.mulf %25, %12 : vector<1x32xf32>
    %29 = arith.mulf %26, %24 : vector<1x32xf32>
    %30 = arith.addf %28, %29 : vector<1x32xf32>
    %31 = math.tanh %30 : vector<1x32xf32>
    %32 = arith.mulf %27, %31 : vector<1x32xf32>
    %33 = tpu.concatenate %22, %30 in 1 : vector<1x96xf32>, vector<1x32xf32> -> vector<1x128xf32>
    %34 = arith.index_cast %c0_i32_14 : i32 to index
    %c0_18 = arith.constant 0 : index
    %35 = vector.load %arg9[%34, %c0_18] : memref<8x256xf32, #tpu.memory_space<vmem>>, vector<1x128xf32>
    tpu.vector_store %arg9[%34, %c0_18], %33 {strides = array<i32>} : memref<8x256xf32, #tpu.memory_space<vmem>>, vector<1x128xf32>,
    %36 = arith.index_cast %c0_i32_14 : i32 to index
    %c0_19 = arith.constant 0 : index
    %37 = vector.load %arg11[%36, %c0_19] : memref<8x32xf32, #tpu.memory_space<vmem>>, vector<1x32xf32>
    tpu.vector_store %arg11[%36, %c0_19], %32 {strides = array<i32>} : memref<8x32xf32, #tpu.memory_space<vmem>>, vector<1x32xf32>,
    %c1_i32 = arith.constant 1 : i32
    %cst_20 = arith.constant dense<0.000000e+00> : vector<1x128xf32>
    %38 = tpu.matmul %32, %10, %cst_20 {dimension_numbers = #tpu.dot_dimension_numbers<[1], [0], [0], [1], [0, 0, 1, 1], [], []>} : vector<1x32xf32>, vector<32x128xf32>, vector<1x128xf32> -> vector<1x128xf32>
    %39 = arith.index_cast %c1_i32 : i32 to index
    %c0_21 = arith.constant 0 : index
    %40 = vector.load %arg10[%39, %c0_21] : memref<8x128xf32, #tpu.memory_space<vmem>>, vector<1x128xf32>
    %41 = arith.addf %38, %40 : vector<1x128xf32>
    %42 = vector.extract_strided_slice %41 {offsets = [0, 0], sizes = [1, 96], strides = [1, 1]} : vector<1x128xf32> to vector<1x96xf32>
    %43 = arith.negf %42 : vector<1x96xf32>
    %44 = math.exp %43 : vector<1x96xf32>
    %cst_22 = arith.constant 1.000000e+00 : f32
    %45 = vector.broadcast %cst_22 : f32 to vector<1x96xf32>
    %46 = arith.addf %45, %44 : vector<1x96xf32>
    %47 = arith.divf %45, %46 : vector<1x96xf32>
    %48 = vector.extract_strided_slice %41 {offsets = [0, 96], sizes = [1, 32], strides = [1, 1]} : vector<1x128xf32> to vector<1x32xf32>
    %49 = math.tanh %48 : vector<1x32xf32>
    %50 = vector.extract_strided_slice %47 {offsets = [0, 0], sizes = [1, 32], strides = [1, 1]} : vector<1x96xf32> to vector<1x32xf32>
    %51 = vector.extract_strided_slice %47 {offsets = [0, 32], sizes = [1, 32], strides = [1, 1]} : vector<1x96xf32> to vector<1x32xf32>
    %52 = vector.extract_strided_slice %47 {offsets = [0, 64], sizes = [1, 32], strides = [1, 1]} : vector<1x96xf32> to vector<1x32xf32>
    %53 = arith.mulf %50, %30 : vector<1x32xf32>
    %54 = arith.mulf %51, %49 : vector<1x32xf32>
    %55 = arith.addf %53, %54 : vector<1x32xf32>
    %56 = math.tanh %55 : vector<1x32xf32>
    %57 = arith.mulf %52, %56 : vector<1x32xf32>
    %58 = tpu.concatenate %47, %55 in 1 : vector<1x96xf32>, vector<1x32xf32> -> vector<1x128xf32>
    %59 = arith.index_cast %c1_i32 : i32 to index
    %c0_23 = arith.constant 0 : index
    %60 = vector.load %arg9[%59, %c0_23] : memref<8x256xf32, #tpu.memory_space<vmem>>, vector<1x128xf32>
    tpu.vector_store %arg9[%59, %c0_23], %58 {strides = array<i32>} : memref<8x256xf32, #tpu.memory_space<vmem>>, vector<1x128xf32>,
    %61 = arith.index_cast %c1_i32 : i32 to index
    %c0_24 = arith.constant 0 : index
    %62 = vector.load %arg11[%61, %c0_24] : memref<8x32xf32, #tpu.memory_space<vmem>>, vector<1x32xf32>
    tpu.vector_store %arg11[%61, %c0_24], %57 {strides = array<i32>} : memref<8x32xf32, #tpu.memory_space<vmem>>, vector<1x32xf32>,
    %c2_i32 = arith.constant 2 : i32
    %cst_25 = arith.constant dense<0.000000e+00> : vector<1x128xf32>
    %63 = tpu.matmul %57, %10, %cst_25 {dimension_numbers = #tpu.dot_dimension_numbers<[1], [0], [0], [1], [0, 0, 1, 1], [], []>} : vector<1x32xf32>, vector<32x128xf32>, vector<1x128xf32> -> vector<1x128xf32>
    %64 = arith.index_cast %c2_i32 : i32 to index
    %c0_26 = arith.constant 0 : index
    %65 = vector.load %arg10[%64, %c0_26] : memref<8x128xf32, #tpu.memory_space<vmem>>, vector<1x128xf32>
    %66 = arith.addf %63, %65 : vector<1x128xf32>
    %67 = vector.extract_strided_slice %66 {offsets = [0, 0], sizes = [1, 96], strides = [1, 1]} : vector<1x128xf32> to vector<1x96xf32>
    %68 = arith.negf %67 : vector<1x96xf32>
    %69 = math.exp %68 : vector<1x96xf32>
    %cst_27 = arith.constant 1.000000e+00 : f32
    %70 = vector.broadcast %cst_27 : f32 to vector<1x96xf32>
    %71 = arith.addf %70, %69 : vector<1x96xf32>
    %72 = arith.divf %70, %71 : vector<1x96xf32>
    %73 = vector.extract_strided_slice %66 {offsets = [0, 96], sizes = [1, 32], strides = [1, 1]} : vector<1x128xf32> to vector<1x32xf32>
    %74 = math.tanh %73 : vector<1x32xf32>
    %75 = vector.extract_strided_slice %72 {offsets = [0, 0], sizes = [1, 32], strides = [1, 1]} : vector<1x96xf32> to vector<1x32xf32>
    %76 = vector.extract_strided_slice %72 {offsets = [0, 32], sizes = [1, 32], strides = [1, 1]} : vector<1x96xf32> to vector<1x32xf32>
    %77 = vector.extract_strided_slice %72 {offsets = [0, 64], sizes = [1, 32], strides = [1, 1]} : vector<1x96xf32> to vector<1x32xf32>
    %78 = arith.mulf %75, %55 : vector<1x32xf32>
    %79 = arith.mulf %76, %74 : vector<1x32xf32>
    %80 = arith.addf %78, %79 : vector<1x32xf32>
    %81 = math.tanh %80 : vector<1x32xf32>
    %82 = arith.mulf %77, %81 : vector<1x32xf32>
    %83 = tpu.concatenate %72, %80 in 1 : vector<1x96xf32>, vector<1x32xf32> -> vector<1x128xf32>
    %84 = arith.index_cast %c2_i32 : i32 to index
    %c0_28 = arith.constant 0 : index
    %85 = vector.load %arg9[%84, %c0_28] : memref<8x256xf32, #tpu.memory_space<vmem>>, vector<1x128xf32>
    tpu.vector_store %arg9[%84, %c0_28], %83 {strides = array<i32>} : memref<8x256xf32, #tpu.memory_space<vmem>>, vector<1x128xf32>,
    %86 = arith.index_cast %c2_i32 : i32 to index
    %c0_29 = arith.constant 0 : index
    %87 = vector.load %arg11[%86, %c0_29] : memref<8x32xf32, #tpu.memory_space<vmem>>, vector<1x32xf32>
    tpu.vector_store %arg11[%86, %c0_29], %82 {strides = array<i32>} : memref<8x32xf32, #tpu.memory_space<vmem>>, vector<1x32xf32>,
    %c3_i32 = arith.constant 3 : i32
    %cst_30 = arith.constant dense<0.000000e+00> : vector<1x128xf32>
    %88 = tpu.matmul %82, %10, %cst_30 {dimension_numbers = #tpu.dot_dimension_numbers<[1], [0], [0], [1], [0, 0, 1, 1], [], []>} : vector<1x32xf32>, vector<32x128xf32>, vector<1x128xf32> -> vector<1x128xf32>
    %89 = arith.index_cast %c3_i32 : i32 to index
    %c0_31 = arith.constant 0 : index
    %90 = vector.load %arg10[%89, %c0_31] : memref<8x128xf32, #tpu.memory_space<vmem>>, vector<1x128xf32>
    %91 = arith.addf %88, %90 : vector<1x128xf32>
    %92 = vector.extract_strided_slice %91 {offsets = [0, 0], sizes = [1, 96], strides = [1, 1]} : vector<1x128xf32> to vector<1x96xf32>
    %93 = arith.negf %92 : vector<1x96xf32>
    %94 = math.exp %93 : vector<1x96xf32>
    %cst_32 = arith.constant 1.000000e+00 : f32
    %95 = vector.broadcast %cst_32 : f32 to vector<1x96xf32>
    %96 = arith.addf %95, %94 : vector<1x96xf32>
    %97 = arith.divf %95, %96 : vector<1x96xf32>
    %98 = vector.extract_strided_slice %91 {offsets = [0, 96], sizes = [1, 32], strides = [1, 1]} : vector<1x128xf32> to vector<1x32xf32>
    %99 = math.tanh %98 : vector<1x32xf32>
    %100 = vector.extract_strided_slice %97 {offsets = [0, 0], sizes = [1, 32], strides = [1, 1]} : vector<1x96xf32> to vector<1x32xf32>
    %101 = vector.extract_strided_slice %97 {offsets = [0, 32], sizes = [1, 32], strides = [1, 1]} : vector<1x96xf32> to vector<1x32xf32>
    %102 = vector.extract_strided_slice %97 {offsets = [0, 64], sizes = [1, 32], strides = [1, 1]} : vector<1x96xf32> to vector<1x32xf32>
    %103 = arith.mulf %100, %80 : vector<1x32xf32>
    %104 = arith.mulf %101, %99 : vector<1x32xf32>
    %105 = arith.addf %103, %104 : vector<1x32xf32>
    %106 = math.tanh %105 : vector<1x32xf32>
    %107 = arith.mulf %102, %106 : vector<1x32xf32>
    %108 = tpu.concatenate %97, %105 in 1 : vector<1x96xf32>, vector<1x32xf32> -> vector<1x128xf32>
    %109 = arith.index_cast %c3_i32 : i32 to index
    %c0_33 = arith.constant 0 : index
    %110 = vector.load %arg9[%109, %c0_33] : memref<8x256xf32, #tpu.memory_space<vmem>>, vector<1x128xf32>
    tpu.vector_store %arg9[%109, %c0_33], %108 {strides = array<i32>} : memref<8x256xf32, #tpu.memory_space<vmem>>, vector<1x128xf32>,
    %111 = arith.index_cast %c3_i32 : i32 to index
    %c0_34 = arith.constant 0 : index
    %112 = vector.load %arg11[%111, %c0_34] : memref<8x32xf32, #tpu.memory_space<vmem>>, vector<1x32xf32>
    tpu.vector_store %arg11[%111, %c0_34], %107 {strides = array<i32>} : memref<8x32xf32, #tpu.memory_space<vmem>>, vector<1x32xf32>,
    %c4_i32 = arith.constant 4 : i32
    %cst_35 = arith.constant dense<0.000000e+00> : vector<1x128xf32>
    %113 = tpu.matmul %107, %10, %cst_35 {dimension_numbers = #tpu.dot_dimension_numbers<[1], [0], [0], [1], [0, 0, 1, 1], [], []>} : vector<1x32xf32>, vector<32x128xf32>, vector<1x128xf32> -> vector<1x128xf32>
    %114 = arith.index_cast %c4_i32 : i32 to index
    %c0_36 = arith.constant 0 : index
    %115 = vector.load %arg10[%114, %c0_36] : memref<8x128xf32, #tpu.memory_space<vmem>>, vector<1x128xf32>
    %116 = arith.addf %113, %115 : vector<1x128xf32>
    %117 = vector.extract_strided_slice %116 {offsets = [0, 0], sizes = [1, 96], strides = [1, 1]} : vector<1x128xf32> to vector<1x96xf32>
    %118 = arith.negf %117 : vector<1x96xf32>
    %119 = math.exp %118 : vector<1x96xf32>
    %cst_37 = arith.constant 1.000000e+00 : f32
    %120 = vector.broadcast %cst_37 : f32 to vector<1x96xf32>
    %121 = arith.addf %120, %119 : vector<1x96xf32>
    %122 = arith.divf %120, %121 : vector<1x96xf32>
    %123 = vector.extract_strided_slice %116 {offsets = [0, 96], sizes = [1, 32], strides = [1, 1]} : vector<1x128xf32> to vector<1x32xf32>
    %124 = math.tanh %123 : vector<1x32xf32>
    %125 = vector.extract_strided_slice %122 {offsets = [0, 0], sizes = [1, 32], strides = [1, 1]} : vector<1x96xf32> to vector<1x32xf32>
    %126 = vector.extract_strided_slice %122 {offsets = [0, 32], sizes = [1, 32], strides = [1, 1]} : vector<1x96xf32> to vector<1x32xf32>
    %127 = vector.extract_strided_slice %122 {offsets = [0, 64], sizes = [1, 32], strides = [1, 1]} : vector<1x96xf32> to vector<1x32xf32>
    %128 = arith.mulf %125, %105 : vector<1x32xf32>
    %129 = arith.mulf %126, %124 : vector<1x32xf32>
    %130 = arith.addf %128, %129 : vector<1x32xf32>
    %131 = math.tanh %130 : vector<1x32xf32>
    %132 = arith.mulf %127, %131 : vector<1x32xf32>
    %133 = tpu.concatenate %122, %130 in 1 : vector<1x96xf32>, vector<1x32xf32> -> vector<1x128xf32>
    %134 = arith.index_cast %c4_i32 : i32 to index
    %c0_38 = arith.constant 0 : index
    %135 = vector.load %arg9[%134, %c0_38] : memref<8x256xf32, #tpu.memory_space<vmem>>, vector<1x128xf32>
    tpu.vector_store %arg9[%134, %c0_38], %133 {strides = array<i32>} : memref<8x256xf32, #tpu.memory_space<vmem>>, vector<1x128xf32>,
    %136 = arith.index_cast %c4_i32 : i32 to index
    %c0_39 = arith.constant 0 : index
    %137 = vector.load %arg11[%136, %c0_39] : memref<8x32xf32, #tpu.memory_space<vmem>>, vector<1x32xf32>
    tpu.vector_store %arg11[%136, %c0_39], %132 {strides = array<i32>} : memref<8x32xf32, #tpu.memory_space<vmem>>, vector<1x32xf32>,
    %c5_i32 = arith.constant 5 : i32
    %cst_40 = arith.constant dense<0.000000e+00> : vector<1x128xf32>
    %138 = tpu.matmul %132, %10, %cst_40 {dimension_numbers = #tpu.dot_dimension_numbers<[1], [0], [0], [1], [0, 0, 1, 1], [], []>} : vector<1x32xf32>, vector<32x128xf32>, vector<1x128xf32> -> vector<1x128xf32>
    %139 = arith.index_cast %c5_i32 : i32 to index
    %c0_41 = arith.constant 0 : index
    %140 = vector.load %arg10[%139, %c0_41] : memref<8x128xf32, #tpu.memory_space<vmem>>, vector<1x128xf32>
    %141 = arith.addf %138, %140 : vector<1x128xf32>
    %142 = vector.extract_strided_slice %141 {offsets = [0, 0], sizes = [1, 96], strides = [1, 1]} : vector<1x128xf32> to vector<1x96xf32>
    %143 = arith.negf %142 : vector<1x96xf32>
    %144 = math.exp %143 : vector<1x96xf32>
    %cst_42 = arith.constant 1.000000e+00 : f32
    %145 = vector.broadcast %cst_42 : f32 to vector<1x96xf32>
    %146 = arith.addf %145, %144 : vector<1x96xf32>
    %147 = arith.divf %145, %146 : vector<1x96xf32>
    %148 = vector.extract_strided_slice %141 {offsets = [0, 96], sizes = [1, 32], strides = [1, 1]} : vector<1x128xf32> to vector<1x32xf32>
    %149 = math.tanh %148 : vector<1x32xf32>
    %150 = vector.extract_strided_slice %147 {offsets = [0, 0], sizes = [1, 32], strides = [1, 1]} : vector<1x96xf32> to vector<1x32xf32>
    %151 = vector.extract_strided_slice %147 {offsets = [0, 32], sizes = [1, 32], strides = [1, 1]} : vector<1x96xf32> to vector<1x32xf32>
    %152 = vector.extract_strided_slice %147 {offsets = [0, 64], sizes = [1, 32], strides = [1, 1]} : vector<1x96xf32> to vector<1x32xf32>
    %153 = arith.mulf %150, %130 : vector<1x32xf32>
    %154 = arith.mulf %151, %149 : vector<1x32xf32>
    %155 = arith.addf %153, %154 : vector<1x32xf32>
    %156 = math.tanh %155 : vector<1x32xf32>
    %157 = arith.mulf %152, %156 : vector<1x32xf32>
    %158 = tpu.concatenate %147, %155 in 1 : vector<1x96xf32>, vector<1x32xf32> -> vector<1x128xf32>
    %159 = arith.index_cast %c5_i32 : i32 to index
    %c0_43 = arith.constant 0 : index
    %160 = vector.load %arg9[%159, %c0_43] : memref<8x256xf32, #tpu.memory_space<vmem>>, vector<1x128xf32>
    tpu.vector_store %arg9[%159, %c0_43], %158 {strides = array<i32>} : memref<8x256xf32, #tpu.memory_space<vmem>>, vector<1x128xf32>,
    %161 = arith.index_cast %c5_i32 : i32 to index
    %c0_44 = arith.constant 0 : index
    %162 = vector.load %arg11[%161, %c0_44] : memref<8x32xf32, #tpu.memory_space<vmem>>, vector<1x32xf32>
    tpu.vector_store %arg11[%161, %c0_44], %157 {strides = array<i32>} : memref<8x32xf32, #tpu.memory_space<vmem>>, vector<1x32xf32>,
    %c6_i32 = arith.constant 6 : i32
    %cst_45 = arith.constant dense<0.000000e+00> : vector<1x128xf32>
    %163 = tpu.matmul %157, %10, %cst_45 {dimension_numbers = #tpu.dot_dimension_numbers<[1], [0], [0], [1], [0, 0, 1, 1], [], []>} : vector<1x32xf32>, vector<32x128xf32>, vector<1x128xf32> -> vector<1x128xf32>
    %164 = arith.index_cast %c6_i32 : i32 to index
    %c0_46 = arith.constant 0 : index
    %165 = vector.load %arg10[%164, %c0_46] : memref<8x128xf32, #tpu.memory_space<vmem>>, vector<1x128xf32>
    %166 = arith.addf %163, %165 : vector<1x128xf32>
    %167 = vector.extract_strided_slice %166 {offsets = [0, 0], sizes = [1, 96], strides = [1, 1]} : vector<1x128xf32> to vector<1x96xf32>
    %168 = arith.negf %167 : vector<1x96xf32>
    %169 = math.exp %168 : vector<1x96xf32>
    %cst_47 = arith.constant 1.000000e+00 : f32
    %170 = vector.broadcast %cst_47 : f32 to vector<1x96xf32>
    %171 = arith.addf %170, %169 : vector<1x96xf32>
    %172 = arith.divf %170, %171 : vector<1x96xf32>
    %173 = vector.extract_strided_slice %166 {offsets = [0, 96], sizes = [1, 32], strides = [1, 1]} : vector<1x128xf32> to vector<1x32xf32>
    %174 = math.tanh %173 : vector<1x32xf32>
    %175 = vector.extract_strided_slice %172 {offsets = [0, 0], sizes = [1, 32], strides = [1, 1]} : vector<1x96xf32> to vector<1x32xf32>
    %176 = vector.extract_strided_slice %172 {offsets = [0, 32], sizes = [1, 32], strides = [1, 1]} : vector<1x96xf32> to vector<1x32xf32>
    %177 = vector.extract_strided_slice %172 {offsets = [0, 64], sizes = [1, 32], strides = [1, 1]} : vector<1x96xf32> to vector<1x32xf32>
    %178 = arith.mulf %175, %155 : vector<1x32xf32>
    %179 = arith.mulf %176, %174 : vector<1x32xf32>
    %180 = arith.addf %178, %179 : vector<1x32xf32>
    %181 = math.tanh %180 : vector<1x32xf32>
    %182 = arith.mulf %177, %181 : vector<1x32xf32>
    %183 = tpu.concatenate %172, %180 in 1 : vector<1x96xf32>, vector<1x32xf32> -> vector<1x128xf32>
    %184 = arith.index_cast %c6_i32 : i32 to index
    %c0_48 = arith.constant 0 : index
    %185 = vector.load %arg9[%184, %c0_48] : memref<8x256xf32, #tpu.memory_space<vmem>>, vector<1x128xf32>
    tpu.vector_store %arg9[%184, %c0_48], %183 {strides = array<i32>} : memref<8x256xf32, #tpu.memory_space<vmem>>, vector<1x128xf32>,
    %186 = arith.index_cast %c6_i32 : i32 to index
    %c0_49 = arith.constant 0 : index
    %187 = vector.load %arg11[%186, %c0_49] : memref<8x32xf32, #tpu.memory_space<vmem>>, vector<1x32xf32>
    tpu.vector_store %arg11[%186, %c0_49], %182 {strides = array<i32>} : memref<8x32xf32, #tpu.memory_space<vmem>>, vector<1x32xf32>,
    %c7_i32 = arith.constant 7 : i32
    %cst_50 = arith.constant dense<0.000000e+00> : vector<1x128xf32>
    %188 = tpu.matmul %182, %10, %cst_50 {dimension_numbers = #tpu.dot_dimension_numbers<[1], [0], [0], [1], [0, 0, 1, 1], [], []>} : vector<1x32xf32>, vector<32x128xf32>, vector<1x128xf32> -> vector<1x128xf32>
    %189 = arith.index_cast %c7_i32 : i32 to index
    %c0_51 = arith.constant 0 : index
    %190 = vector.load %arg10[%189, %c0_51] : memref<8x128xf32, #tpu.memory_space<vmem>>, vector<1x128xf32>
    %191 = arith.addf %188, %190 : vector<1x128xf32>
    %192 = vector.extract_strided_slice %191 {offsets = [0, 0], sizes = [1, 96], strides = [1, 1]} : vector<1x128xf32> to vector<1x96xf32>
    %193 = arith.negf %192 : vector<1x96xf32>
    %194 = math.exp %193 : vector<1x96xf32>
    %cst_52 = arith.constant 1.000000e+00 : f32
    %195 = vector.broadcast %cst_52 : f32 to vector<1x96xf32>
    %196 = arith.addf %195, %194 : vector<1x96xf32>
    %197 = arith.divf %195, %196 : vector<1x96xf32>
    %198 = vector.extract_strided_slice %191 {offsets = [0, 96], sizes = [1, 32], strides = [1, 1]} : vector<1x128xf32> to vector<1x32xf32>
    %199 = math.tanh %198 : vector<1x32xf32>
    %200 = vector.extract_strided_slice %197 {offsets = [0, 0], sizes = [1, 32], strides = [1, 1]} : vector<1x96xf32> to vector<1x32xf32>
    %201 = vector.extract_strided_slice %197 {offsets = [0, 32], sizes = [1, 32], strides = [1, 1]} : vector<1x96xf32> to vector<1x32xf32>
    %202 = vector.extract_strided_slice %197 {offsets = [0, 64], sizes = [1, 32], strides = [1, 1]} : vector<1x96xf32> to vector<1x32xf32>
    %203 = arith.mulf %200, %180 : vector<1x32xf32>
    %204 = arith.mulf %201, %199 : vector<1x32xf32>
    %205 = arith.addf %203, %204 : vector<1x32xf32>
    %206 = math.tanh %205 : vector<1x32xf32>
    %207 = arith.mulf %202, %206 : vector<1x32xf32>
    %208 = tpu.concatenate %197, %205 in 1 : vector<1x96xf32>, vector<1x32xf32> -> vector<1x128xf32>
    %209 = arith.index_cast %c7_i32 : i32 to index
    %c0_53 = arith.constant 0 : index
    %210 = vector.load %arg9[%209, %c0_53] : memref<8x256xf32, #tpu.memory_space<vmem>>, vector<1x128xf32>
    tpu.vector_store %arg9[%209, %c0_53], %208 {strides = array<i32>} : memref<8x256xf32, #tpu.memory_space<vmem>>, vector<1x128xf32>,
    %211 = arith.index_cast %c7_i32 : i32 to index
    %c0_54 = arith.constant 0 : index
    %212 = vector.load %arg11[%211, %c0_54] : memref<8x32xf32, #tpu.memory_space<vmem>>, vector<1x32xf32>
    tpu.vector_store %arg11[%211, %c0_54], %207 {strides = array<i32>} : memref<8x32xf32, #tpu.memory_space<vmem>>, vector<1x32xf32>,
    %c8_i32 = arith.constant 8 : i32
    %c0_55 = arith.constant 0 : index
    %c0_56 = arith.constant 0 : index
    %213 = vector.load %arg12[%c0_55, %c0_56] : memref<1x32xf32, #tpu.memory_space<vmem>>, vector<1x32xf32>
    tpu.vector_store %arg12[%c0_55, %c0_56], %207 {strides = array<i32>} : memref<1x32xf32, #tpu.memory_space<vmem>>, vector<1x32xf32>,
    %c0_57 = arith.constant 0 : index
    %c0_58 = arith.constant 0 : index
    %214 = vector.load %arg13[%c0_57, %c0_58] : memref<1x32xf32, #tpu.memory_space<vmem>>, vector<1x32xf32>
    tpu.vector_store %arg13[%c0_57, %c0_58], %205 {strides = array<i32>} : memref<1x32xf32, #tpu.memory_space<vmem>>, vector<1x32xf32>,
    %c0_59 = arith.constant 0 : index
    %c0_60 = arith.constant 0 : index
    %215 = vector.load %arg11[%c0_59, %c0_60] : memref<8x32xf32, #tpu.memory_space<vmem>>, vector<8x32xf32>
    %c0_61 = arith.constant 0 : index
    %c128 = arith.constant 128 : index
    %216 = vector.load %arg9[%c0_61, %c128] : memref<8x256xf32, #tpu.memory_space<vmem>>, vector<8x32xf32>
    tpu.vector_store %arg9[%c0_61, %c128], %215 {strides = array<i32>} : memref<8x256xf32, #tpu.memory_space<vmem>>, vector<8x32xf32>,
    %c0_62 = arith.constant 0 : index
    %c0_63 = arith.constant 0 : index
    %217 = vector.load %arg7[%c0_62, %c0_63] : memref<32x8xf32, #tpu.memory_space<vmem>>, vector<32x8xf32>
    %cst_64 = arith.constant dense<0.000000e+00> : vector<8x8xf32>
    %218 = tpu.matmul %215, %217, %cst_64 {dimension_numbers = #tpu.dot_dimension_numbers<[1], [0], [0], [1], [0, 0, 1, 1], [], []>} : vector<8x32xf32>, vector<32x8xf32>, vector<8x8xf32> -> vector<8x8xf32>
    %c0_65 = arith.constant 0 : index
    %c0_66 = arith.constant 0 : index
    %219 = vector.load %arg8[%c0_65, %c0_66] : memref<1x8xf32, #tpu.memory_space<vmem>>, vector<1x8xf32>
    %220 = vector.broadcast %219 : vector<1x8xf32> to vector<8x8xf32>
    %221 = arith.addf %218, %220 : vector<8x8xf32>
    %c0_67 = arith.constant 0 : index
    %c160 = arith.constant 160 : index
    %222 = vector.load %arg9[%c0_67, %c160] : memref<8x256xf32, #tpu.memory_space<vmem>>, vector<8x8xf32>
    tpu.vector_store %arg9[%c0_67, %c160], %221 {strides = array<i32>} : memref<8x256xf32, #tpu.memory_space<vmem>>, vector<8x8xf32>,
    return
  }
  func.func @transform_0(%arg0: i32) -> (i32, i32) {
    %c0_i32 = arith.constant 0 : i32
    %c0_i32_0 = arith.constant 0 : i32
    return %arg0, %c0_i32 : i32, i32
  }
  func.func @transform_1(%arg0: i32) -> (i32, i32) {
    %c0_i32 = arith.constant 0 : i32
    %c0_i32_0 = arith.constant 0 : i32
    %c0_i32_1 = arith.constant 0 : i32
    return %c0_i32, %c0_i32_0 : i32, i32
  }
  func.func @transform_2(%arg0: i32) -> (i32, i32) {
    %c0_i32 = arith.constant 0 : i32
    %c0_i32_0 = arith.constant 0 : i32
    %c0_i32_1 = arith.constant 0 : i32
    return %c0_i32, %c0_i32_0 : i32, i32
  }
  func.func @transform_3(%arg0: i32) -> (i32, i32) {
    %c0_i32 = arith.constant 0 : i32
    %c0_i32_0 = arith.constant 0 : i32
    %c0_i32_1 = arith.constant 0 : i32
    return %c0_i32, %c0_i32_0 : i32, i32
  }
  func.func @transform_4(%arg0: i32) -> (i32, i32) {
    %c0_i32 = arith.constant 0 : i32
    %c0_i32_0 = arith.constant 0 : i32
    %c0_i32_1 = arith.constant 0 : i32
    return %c0_i32, %c0_i32_0 : i32, i32
  }
  func.func @transform_5(%arg0: i32) -> (i32, i32) {
    %c0_i32 = arith.constant 0 : i32
    %c0_i32_0 = arith.constant 0 : i32
    %c0_i32_1 = arith.constant 0 : i32
    return %c0_i32, %c0_i32_0 : i32, i32
  }
  func.func @transform_6(%arg0: i32) -> (i32, i32) {
    %c0_i32 = arith.constant 0 : i32
    %c0_i32_0 = arith.constant 0 : i32
    %c0_i32_1 = arith.constant 0 : i32
    return %c0_i32, %c0_i32_0 : i32, i32
  }
  func.func @transform_7(%arg0: i32) -> (i32, i32) {
    %c0_i32 = arith.constant 0 : i32
    %c0_i32_0 = arith.constant 0 : i32
    %c0_i32_1 = arith.constant 0 : i32
    return %c0_i32, %c0_i32_0 : i32, i32
  }
  func.func @transform_8(%arg0: i32) -> (i32, i32) {
    %c0_i32 = arith.constant 0 : i32
    %c0_i32_0 = arith.constant 0 : i32
    return %arg0, %c0_i32 : i32, i32
  }
}

</mosaic_0001>

<bundles_post_ra>
// kernel: crplstm_sequence.1
= control target key start
LH: loop header
LB: loop body
LE: loop exit
PB: predicated region body
PF: predicated region fallthrough
CT: control target
= control target key end

     0   :  { %13 = vsyncpa [#allocation7], 0  ;;  %s1378_s27 = smov [#allocation6]   ;;  %s1749_s0 = inlined_call_operand.vmem [shape: f32[8,16], index: 0, kind: input, shape index: {}]   ;;  %s1750_s1 = inlined_call_operand.vmem [shape: f32[1,32], index: 1, kind: input, shape index: {}]   ;;  %s1751_s2 = inlined_call_operand.vmem [shape: f32[1,32], index: 2, kind: input, shape index: {}]   ;;  %s1752_s3 = inlined_call_operand.hbm [shape: f32[16,128], index: 3, kind: input, shape index: {}]   ;;  %s1753_s4 = inlined_call_operand.vmem [shape: f32[32,128], index: 4, kind: input, shape index: {}]   ;;  %s1754_s5 = inlined_call_operand.vmem [shape: f32[1,128], index: 5, kind: input, shape index: {}]   ;;  %s1755_s6 = inlined_call_operand.vmem [shape: f32[32,8], index: 6, kind: input, shape index: {}]   ;;  %s1756_s7 = inlined_call_operand.vmem [shape: f32[1,8], index: 7, kind: input, shape index: {}]   ;;  %s1757_s8 = inlined_call_operand.vmem [shape: f32[8,256], index: 8, kind: output, shape index: {}]  }
   0x1   :  { %s25_s28 = sshll.u32 %s1378_s27, 4  ;;  %s26_s28 = int_to_ptr.vmem [resolvable:$true] %s25_s28 }
   0x2   :  { %s1364_s29 = scalar_lea.vmem %s26_s28, 256  ;;  %p1369_p1 = scmp.lt.s32.totalorder %s26_s28, %s26_s28 }
   0x3   :  { %p1365_p0 = scmp.ne.s32.totalorder %s26_s28, %s1364_s29  ;;  %p1370_p2 = scmp.lt.s32.totalorder %s1364_s29, %s1364_s29 }
   0x5   :  { %p1371_p3 = por %p1370_p2, %p1369_p1 }
   0x7   :  { %p1372_p4 = pnand %p1371_p3, %p1365_p0 }
   0x9   :  { %1375 = shalt.err (!%p1372_p4)
}
   0xa   :  { %s1379_s30 = smov 128   ;;  %s1380_s9 = smov 8  }
   0xb   :  { %31 = dma.hbm_to_vmem [thread:$0]  %s1752_s3, 256, %s26_s28, [#allocation7], %s1379_s30, %s1379_s30, %s1380_s9  }
   0xc   :  { %1376 = dma.done.wait [#allocation7], 256  }
   0xd   :  { %1377 = vsyncadd [#allocation7], 4294967040  ;;  %v1381_v0 = vmov 0.0   ;;  %vm1382_vm0 = vmmov 0   ;;  %v54_v1 = vld [vmem:[#allocation6 + $0x8] sm:$0xff]  ;;  %v53_v2 = vld [vmem:[#allocation6] sm:$0xff] }
   0xe   :  { %1178 = vmatprep.subr.mxu0 %v1381_v0  ;;  %1182 = vmatprep.mubr.msk.f32.mxu0 %vm1382_vm0, %v1381_v0  ;;  %vm48_vm1 = vcmask 253952   ;;  %v52_v3 = vld [vmem:[%s1749_s0] sm:$0xff]  ;;  %vm62_vm2 = vcmask 130048   ;;  %v1446_v4 = vld [vmem:[%s1753_s4 + $0x18] sm:$0xff]  ;;  %v1451_v5 = vld [vmem:[%s1753_s4 + $0x10] sm:$0xff]  ;;  %vm144_vm3 = vcmask 261120  }
   0xf   :  { %1185 = vmatprep.subr.mxu1 %v1381_v0  ;;  %1193 = vmatprep.mubr.msk.f32.mxu1 %vm1382_vm0, %v1381_v0  ;;  %v47_v6 = vld [vmem:[%s1750_s1] sm:$0x1]  ;;  %v1462_v7 = vld [vmem:[%s1753_s4 + $0x8] sm:$0xff]  ;;  %s1383_s24 = smov 64   ;;  %vm246_vm4 = vcmask 785408   ;;  %vm1103_vm5 = vcmask 326912  }
  0x10   :  { %1179 = vmatpush3.msra.mxu0 %v54_v1  ;;  %1186 = vmatpush3.msra.mxu1 %v1446_v4  ;;  %49 = vst.msk [vmem:[#allocation4] sm:$0x1] %vm48_vm1, %v47_v6  ;;  %v1470_v8 = vld [vmem:[%s1753_s4] sm:$0xff] }
  0x11   :  { %1180 = vmatprep.subr.mxu0 %v1381_v0  ;;  %1187 = vmatprep.subr.mxu1 %v1381_v0  ;;  %v50_v10 = vld [vmem:[%s1751_s2] sm:$0x1]  ;;  %s1384_s2 = smov 96  }
  0x12   :  { %1181 = vmatpush3.msra.mxu0 %v53_v2  ;;  %1188 = vmatpush3.msra.mxu1 %v1451_v5  ;;  %51 = vst.msk [vmem:[#allocation5] sm:$0x1] %vm48_vm1, %v50_v10  ;;  %v1110_v11 = vld [vmem:[%s1754_s5] ss:$0 sm:$0xff] }
  0x13   :  { %1183 = vmatmul.mubr.msk.f32.vlgmr.msra.gmra.mxu0 %vm62_vm2, %v52_v3  ;;  %1189 = vmatprep.subr.mxu1 %v1381_v0 }
  0x14   :  { %1196 = vmatprep.subr.mxu0 %v1381_v0  ;;  %1190 = vmatpush3.msra.mxu1 %v1462_v7 }
  0x15   :  { %1197 = vmatpush3.msra.mxu0 %v1446_v4  ;;  %1191 = vmatprep.subr.mxu1 %v1381_v0 }
  0x16   :  { %1198 = vmatprep.subr.mxu0 %v1381_v0  ;;  %1192 = vmatpush3.msra.mxu1 %v1470_v8 }
  0x17   :  { %1199 = vmatpush3.msra.mxu0 %v1451_v5  ;;  %1204 = vmatprep.mubr.msk.f32.mxu0 %vm1382_vm0, %v1381_v0  ;;  %v141_v9 = vld [vmem:[#allocation4] sm:$0x1] }
  0x18   :  { %1200 = vmatprep.subr.mxu0 %v1381_v0  ;;  %1207 = vmatprep.subr.mxu1 %v1381_v0 }
  0x19   :  { %1201 = vmatpush3.msra.mxu0 %v1462_v7  ;;  %1194 = vmatmul.mubr.msk.f32.vlgmr.msra.gmra.mxu1 %vm144_vm3, %v141_v9  ;;  %v142_v26 = vld [vmem:[#allocation5] sm:$0x1] }
  0x1a   :  { %1202 = vmatprep.subr.mxu0 %v1381_v0  ;;  %1208 = vmatpush3.msra.mxu1 %v1446_v4 }
  0x1b   :  { %1203 = vmatpush3.msra.mxu0 %v1470_v8  ;;  %1209 = vmatprep.subr.mxu1 %v1381_v0 }
  0x1c   :  { %1215 = vmatprep.mubr.msk.f32.mxu1 %vm1382_vm0, %v1381_v0  ;;  %1210 = vmatpush3.msra.mxu1 %v1451_v5 }
  0x1d   :  { %1218 = vmatprep.subr.mxu0 %v1381_v0  ;;  %1211 = vmatprep.subr.mxu1 %v1381_v0 }
  0x1e   :  { %1212 = vmatpush3.msra.mxu1 %v1462_v7 }
  0x1f   :  { %1213 = vmatprep.subr.mxu1 %v1381_v0 }
  0x20   :  { %1214 = vmatpush3.msra.mxu1 %v1470_v8 }
  0x21   :  { %1229 = vmatprep.subr.mxu1 %v1381_v0 }
  0xd3   :  { %v132_v12 = vpop.f32.mrf.mxu0 }
  0xd4   :  { %v133_v13 = vadd.f32 %v1110_v11, %v132_v12 }
  0xd5   :  { %v1184_v14 = vpop.f32.mrf.mxu0 }
  0xd6   :  { %136 = vst [vmem:[#allocation2] sm:$0xff] %v133_v13 }
  0xd9   :  { %v214_v15 = vpop.f32.mrf.mxu1 }
  0xdb   :  { %v1195_v16 = vpop.f32.mrf.mxu1 }
  0xdd   :  { %v143_v17 = vld [vmem:[#allocation2] sm:$0x1]  ;;  %v255_v34 = vld [vmem:[#allocation2 + $0x1] sm:$0x1]  ;;  %v363_v52 = vld [vmem:[#allocation2 + $0x2] sm:$0x1] }
  0xde   :  { %v215_v18 = vadd.f32 %v214_v15, %v143_v17  ;;  %v471_v11 = vld [vmem:[#allocation2 + $0x3] sm:$0x1] }
  0xe0   :  { %1292 = vtanh.f32 %v215_v18  ;;  %v1113_v20 = vmul.f32 -1.442695, %v215_v18 }
  0xe2   :  { %1294 = vpow2.f32 %v1113_v20 }
  0xed   :  { %v1293_v19 = vpop.eup %1292 }
  0xee   :  { %227 = vrot.lane.b32.xlu0 %v1293_v19, %s1383_s24 }
  0xef   :  { %v1295_v21 = vpop.eup %1294 }
  0xf0   :  { %v221_v22 = vadd.f32 1.0, %v1295_v21 }
  0xf2   :  { %1296 = vrcp.f32 %v221_v22 }
  0xff   :  { %v1506_v23 = vpop.eup %1296 }
 0x100   :  { %v225_v27 = vmul.f32 %v1506_v23, %v142_v26 }
 0x160   :  { %v228_v24 = vpop.permute.xlu0 %227 }
 0x161   :  { %v230_v25 = vmul.f32 %v1506_v23, %v228_v24 }
 0x163   :  { %232 = vrot.lane.b32.xlu0 %v230_v25, %s1384_s2 }
 0x1d5   :  { %v233_v28 = vpop.permute.xlu0 %232 }
 0x1d6   :  { %v1511_v29 = vadd.f32 %v233_v28, %v225_v27 }
 0x1d8   :  { %1298 = vtanh.f32 %v1511_v29 }
 0x1e5   :  { %v1299_v30 = vpop.eup %1298 }
 0x1e6   :  { %238 = vrot.lane.b32.xlu1 %v1299_v30, %s1383_s24 }
 0x258   :  { %v239_v31 = vpop.permute.xlu1 %238 }
 0x259   :  { %v241_v32 = vmul.f32 %v1506_v23, %v239_v31  ;;  %v579_v31 = vld [vmem:[#allocation2 + $0x4] sm:$0x1] }
 0x25b   :  { %250 = vrot.lane.b32.xlu1 %v241_v32, %s1383_s24 }
 0x2cd   :  { %v251_v33 = vpop.permute.xlu1 %250 }
 0x2ce   :  { %254 = vst.msk [vmem:[#allocation3] sm:$0x1] %vm48_vm1, %v251_v33  ;;  %1205 = vmatmul.mubr.msk.f32.vlgmr.msra.gmra.mxu0 %vm144_vm3, %v251_v33 }
 0x2cf   :  { %1219 = vmatpush3.msra.mxu0 %v1446_v4  ;;  %1226 = vmatprep.mubr.msk.f32.mxu0 %vm1382_vm0, %v1381_v0 }
 0x2d0   :  { %1220 = vmatprep.subr.mxu0 %v1381_v0 }
 0x2d1   :  { %1221 = vmatpush3.msra.mxu0 %v1451_v5 }
 0x2d2   :  { %1222 = vmatprep.subr.mxu0 %v1381_v0 }
 0x2d3   :  { %1223 = vmatpush3.msra.mxu0 %v1462_v7 }
 0x2d4   :  { %1224 = vmatprep.subr.mxu0 %v1381_v0 }
 0x2d5   :  { %1225 = vmatpush3.msra.mxu0 %v1470_v8 }
 0x2d6   :  { %1240 = vmatprep.subr.mxu0 %v1381_v0 }
 0x38e   :  { %v324_v35 = vpop.f32.mrf.mxu0 }
 0x38f   :  { %v325_v36 = vadd.f32 %v324_v35, %v255_v34 }
 0x390   :  { %v1206_v37 = vpop.f32.mrf.mxu0 }
 0x391   :  { %1300 = vtanh.f32 %v325_v36  ;;  %v1115_v39 = vmul.f32 -1.442695, %v325_v36 }
 0x393   :  { %1302 = vpow2.f32 %v1115_v39 }
 0x39e   :  { %v1301_v38 = vpop.eup %1300 }
 0x39f   :  { %337 = vrot.lane.b32.xlu0 %v1301_v38, %s1383_s24 }
 0x3a0   :  { %v1303_v40 = vpop.eup %1302 }
 0x3a1   :  { %v331_v41 = vadd.f32 1.0, %v1303_v40 }
 0x3a3   :  { %1304 = vrcp.f32 %v331_v41 }
 0x3b0   :  { %v1530_v42 = vpop.eup %1304 }
 0x3b1   :  { %v335_v45 = vmul.f32 %v1530_v42, %v1511_v29 }
 0x411   :  { %v338_v43 = vpop.permute.xlu0 %337 }
 0x412   :  { %v340_v44 = vmul.f32 %v1530_v42, %v338_v43 }
 0x414   :  { %342 = vrot.lane.b32.xlu1 %v340_v44, %s1384_s2 }
 0x486   :  { %v343_v46 = vpop.permute.xlu1 %342 }
 0x487   :  { %v1536_v47 = vadd.f32 %v343_v46, %v335_v45 }
 0x489   :  { %1306 = vtanh.f32 %v1536_v47 }
 0x496   :  { %v1307_v48 = vpop.eup %1306 }
 0x497   :  { %348 = vrot.lane.b32.xlu0 %v1307_v48, %s1383_s24 }
 0x509   :  { %v349_v49 = vpop.permute.xlu0 %348 }
 0x50a   :  { %v351_v50 = vmul.f32 %v1530_v42, %v349_v49 }
 0x50c   :  { %359 = vrot.lane.b32.xlu1 %v351_v50, %s1383_s24 }
 0x57e   :  { %v360_v51 = vpop.permute.xlu1 %359 }
 0x57f   :  { %362 = vst.msk [vmem:[#allocation3 + $0x1] sm:$0x1] %vm48_vm1, %v360_v51  ;;  %1216 = vmatmul.mubr.msk.f32.vlgmr.msra.gmra.mxu1 %vm144_vm3, %v360_v51  ;;  %v687_v51 = vld [vmem:[#allocation2 + $0x5] sm:$0x1] }
 0x580   :  { %1230 = vmatpush3.msra.mxu1 %v1446_v4  ;;  %1237 = vmatprep.mubr.msk.f32.mxu1 %vm1382_vm0, %v1381_v0 }
 0x581   :  { %1231 = vmatprep.subr.mxu1 %v1381_v0 }
 0x582   :  { %1232 = vmatpush3.msra.mxu1 %v1451_v5 }
 0x583   :  { %1233 = vmatprep.subr.mxu1 %v1381_v0 }
 0x584   :  { %1234 = vmatpush3.msra.mxu1 %v1462_v7 }
 0x585   :  { %1235 = vmatprep.subr.mxu1 %v1381_v0 }
 0x586   :  { %1236 = vmatpush3.msra.mxu1 %v1470_v8 }
 0x587   :  { %1251 = vmatprep.subr.mxu1 %v1381_v0 }
 0x63f   :  { %v432_v53 = vpop.f32.mrf.mxu1 }
 0x640   :  { %v433_v54 = vadd.f32 %v432_v53, %v363_v52 }
 0x641   :  { %v1217_v55 = vpop.f32.mrf.mxu1 }
 0x642   :  { %1308 = vtanh.f32 %v433_v54  ;;  %v1117_v57 = vmul.f32 -1.442695, %v433_v54 }
 0x644   :  { %1310 = vpow2.f32 %v1117_v57 }
 0x64f   :  { %v1309_v56 = vpop.eup %1308 }
 0x650   :  { %445 = vrot.lane.b32.xlu0 %v1309_v56, %s1383_s24 }
 0x651   :  { %v1311_v58 = vpop.eup %1310 }
 0x652   :  { %v439_v59 = vadd.f32 1.0, %v1311_v58 }
 0x654   :  { %1312 = vrcp.f32 %v439_v59 }
 0x661   :  { %v1555_v60 = vpop.eup %1312 }
 0x662   :  { %v443_v63 = vmul.f32 %v1555_v60, %v1536_v47 }
 0x6c2   :  { %v446_v61 = vpop.permute.xlu0 %445 }
 0x6c3   :  { %v448_v62 = vmul.f32 %v1555_v60, %v446_v61 }
 0x6c5   :  { %450 = vrot.lane.b32.xlu1 %v448_v62, %s1384_s2 }
 0x737   :  { %v451_v1 = vpop.permute.xlu1 %450 }
 0x738   :  { %v1561_v2 = vadd.f32 %v451_v1, %v443_v63 }
 0x73a   :  { %1314 = vtanh.f32 %v1561_v2 }
 0x747   :  { %v1315_v3 = vpop.eup %1314 }
 0x748   :  { %456 = vrot.lane.b32.xlu0 %v1315_v3, %s1383_s24 }
 0x7ba   :  { %v457_v6 = vpop.permute.xlu0 %456 }
 0x7bb   :  { %v459_v9 = vmul.f32 %v1555_v60, %v457_v6  ;;  %v795_v6 = vld [vmem:[#allocation2 + $0x6] sm:$0x1] }
 0x7bd   :  { %467 = vrot.lane.b32.xlu1 %v459_v9, %s1383_s24 }
 0x82f   :  { %v468_v10 = vpop.permute.xlu1 %467 }
 0x830   :  { %470 = vst.msk [vmem:[#allocation3 + $0x2] sm:$0x1] %vm48_vm1, %v468_v10  ;;  %1227 = vmatmul.mubr.msk.f32.vlgmr.msra.gmra.mxu0 %vm144_vm3, %v468_v10 }
 0x831   :  { %1241 = vmatpush3.msra.mxu0 %v1446_v4  ;;  %1248 = vmatprep.mubr.msk.f32.mxu0 %vm1382_vm0, %v1381_v0 }
 0x832   :  { %1242 = vmatprep.subr.mxu0 %v1381_v0 }
 0x833   :  { %1243 = vmatpush3.msra.mxu0 %v1451_v5 }
 0x834   :  { %1244 = vmatprep.subr.mxu0 %v1381_v0 }
 0x835   :  { %1245 = vmatpush3.msra.mxu0 %v1462_v7 }
 0x836   :  { %1246 = vmatprep.subr.mxu0 %v1381_v0 }
 0x837   :  { %1247 = vmatpush3.msra.mxu0 %v1470_v8 }
 0x838   :  { %1262 = vmatprep.subr.mxu0 %v1381_v0 }
 0x8f0   :  { %v540_v12 = vpop.f32.mrf.mxu0 }
 0x8f1   :  { %v541_v13 = vadd.f32 %v540_v12, %v471_v11 }
 0x8f2   :  { %v1228_v14 = vpop.f32.mrf.mxu0 }
 0x8f3   :  { %1316 = vtanh.f32 %v541_v13  ;;  %v1119_v16 = vmul.f32 -1.442695, %v541_v13 }
 0x8f5   :  { %1318 = vpow2.f32 %v1119_v16 }
 0x900   :  { %v1317_v15 = vpop.eup %1316 }
 0x901   :  { %553 = vrot.lane.b32.xlu0 %v1317_v15, %s1383_s24 }
 0x902   :  { %v1319_v17 = vpop.eup %1318 }
 0x903   :  { %v547_v18 = vadd.f32 1.0, %v1319_v17 }
 0x905   :  { %1320 = vrcp.f32 %v547_v18 }
 0x912   :  { %v1580_v19 = vpop.eup %1320 }
 0x913   :  { %v551_v22 = vmul.f32 %v1580_v19, %v1561_v2 }
 0x973   :  { %v554_v20 = vpop.permute.xlu0 %553 }
 0x974   :  { %v556_v21 = vmul.f32 %v1580_v19, %v554_v20 }
 0x976   :  { %558 = vrot.lane.b32.xlu1 %v556_v21, %s1384_s2 }
 0x9e8   :  { %v559_v24 = vpop.permute.xlu1 %558 }
 0x9e9   :  { %v1586_v25 = vadd.f32 %v559_v24, %v551_v22 }
 0x9eb   :  { %1322 = vtanh.f32 %v1586_v25 }
 0x9f8   :  { %v1323_v26 = vpop.eup %1322 }
 0x9f9   :  { %564 = vrot.lane.b32.xlu0 %v1323_v26, %s1383_s24 }
 0xa6b   :  { %v565_v27 = vpop.permute.xlu0 %564 }
 0xa6c   :  { %v567_v28 = vmul.f32 %v1580_v19, %v565_v27 }
 0xa6e   :  { %575 = vrot.lane.b32.xlu1 %v567_v28, %s1383_s24 }
 0xae0   :  { %v576_v30 = vpop.permute.xlu1 %575 }
 0xae1   :  { %578 = vst.msk [vmem:[#allocation3 + $0x3] sm:$0x1] %vm48_vm1, %v576_v30  ;;  %1238 = vmatmul.mubr.msk.f32.vlgmr.msra.gmra.mxu1 %vm144_vm3, %v576_v30  ;;  %v903_v30 = vld [vmem:[#allocation2 + $0x7] sm:$0x1] }
 0xae2   :  { %1252 = vmatpush3.msra.mxu1 %v1446_v4  ;;  %1259 = vmatprep.mubr.msk.f32.mxu1 %vm1382_vm0, %v1381_v0 }
 0xae3   :  { %1253 = vmatprep.subr.mxu1 %v1381_v0 }
 0xae4   :  { %1254 = vmatpush3.msra.mxu1 %v1451_v5 }
 0xae5   :  { %1255 = vmatprep.subr.mxu1 %v1381_v0 }
 0xae6   :  { %1256 = vmatpush3.msra.mxu1 %v1462_v7 }
 0xae7   :  { %1257 = vmatprep.subr.mxu1 %v1381_v0 }
 0xae8   :  { %1258 = vmatpush3.msra.mxu1 %v1470_v8 }
 0xae9   :  { %1273 = vmatprep.subr.mxu1 %v1381_v0 }
 0xba1   :  { %v648_v32 = vpop.f32.mrf.mxu1 }
 0xba2   :  { %v649_v33 = vadd.f32 %v648_v32, %v579_v31 }
 0xba3   :  { %v1239_v34 = vpop.f32.mrf.mxu1 }
 0xba4   :  { %1324 = vtanh.f32 %v649_v33  ;;  %v1121_v36 = vmul.f32 -1.442695, %v649_v33 }
 0xba6   :  { %1326 = vpow2.f32 %v1121_v36 }
 0xbb1   :  { %v1325_v35 = vpop.eup %1324 }
 0xbb2   :  { %661 = vrot.lane.b32.xlu0 %v1325_v35, %s1383_s24 }
 0xbb3   :  { %v1327_v37 = vpop.eup %1326 }
 0xbb4   :  { %v655_v38 = vadd.f32 1.0, %v1327_v37 }
 0xbb6   :  { %1328 = vrcp.f32 %v655_v38 }
 0xbc3   :  { %v1605_v39 = vpop.eup %1328 }
 0xbc4   :  { %v659_v43 = vmul.f32 %v1605_v39, %v1586_v25 }
 0xc24   :  { %v662_v40 = vpop.permute.xlu0 %661 }
 0xc25   :  { %v664_v41 = vmul.f32 %v1605_v39, %v662_v40 }
 0xc27   :  { %666 = vrot.lane.b32.xlu1 %v664_v41, %s1384_s2 }
 0xc99   :  { %v667_v44 = vpop.permute.xlu1 %666 }
 0xc9a   :  { %v1611_v45 = vadd.f32 %v667_v44, %v659_v43 }
 0xc9c   :  { %1330 = vtanh.f32 %v1611_v45 }
 0xca9   :  { %v1331_v46 = vpop.eup %1330 }
 0xcaa   :  { %672 = vrot.lane.b32.xlu0 %v1331_v46, %s1383_s24 }
 0xd1c   :  { %v673_v48 = vpop.permute.xlu0 %672 }
 0xd1d   :  { %v675_v49 = vmul.f32 %v1605_v39, %v673_v48 }
 0xd1f   :  { %683 = vrot.lane.b32.xlu1 %v675_v49, %s1383_s24  ;;  %v1018_v49 = vld [vmem:[%s1755_s6 + $0x18] sm:$0xff] }
 0xd91   :  { %v684_v50 = vpop.permute.xlu1 %683 }
 0xd92   :  { %686 = vst.msk [vmem:[#allocation3 + $0x4] sm:$0x1] %vm48_vm1, %v684_v50  ;;  %1249 = vmatmul.mubr.msk.f32.vlgmr.msra.gmra.mxu0 %vm144_vm3, %v684_v50  ;;  %v1017_v50 = vld [vmem:[%s1755_s6 + $0x10] sm:$0xff] }
 0xd93   :  { %1263 = vmatpush3.msra.mxu0 %v1446_v4  ;;  %1270 = vmatprep.mubr.msk.f32.mxu0 %vm1382_vm0, %v1381_v0 }
 0xd94   :  { %1264 = vmatprep.subr.mxu0 %v1381_v0 }
 0xd95   :  { %1265 = vmatpush3.msra.mxu0 %v1451_v5 }
 0xd96   :  { %1266 = vmatprep.subr.mxu0 %v1381_v0 }
 0xd97   :  { %1267 = vmatpush3.msra.mxu0 %v1462_v7 }
 0xd98   :  { %1268 = vmatprep.subr.mxu0 %v1381_v0 }
 0xd99   :  { %1269 = vmatpush3.msra.mxu0 %v1470_v8 }
 0xe52   :  { %v756_v52 = vpop.f32.mrf.mxu0 }
 0xe53   :  { %v757_v53 = vadd.f32 %v756_v52, %v687_v51 }
 0xe54   :  { %v1250_v54 = vpop.f32.mrf.mxu0 }
 0xe55   :  { %1332 = vtanh.f32 %v757_v53  ;;  %v1123_v55 = vmul.f32 -1.442695, %v757_v53 }
 0xe57   :  { %1334 = vpow2.f32 %v1123_v55 }
 0xe62   :  { %v1333_v4 = vpop.eup %1332 }
 0xe63   :  { %769 = vrot.lane.b32.xlu0 %v1333_v4, %s1383_s24 }
 0xe64   :  { %v1335_v56 = vpop.eup %1334 }
 0xe65   :  { %v763_v5 = vadd.f32 1.0, %v1335_v56 }
 0xe67   :  { %1336 = vrcp.f32 %v763_v5 }
 0xe74   :  { %v1629_v57 = vpop.eup %1336 }
 0xe75   :  { %v767_v8 = vmul.f32 %v1629_v57, %v1611_v45 }
 0xed5   :  { %v770_v7 = vpop.permute.xlu0 %769 }
 0xed6   :  { %v772_v58 = vmul.f32 %v1629_v57, %v770_v7 }
 0xed8   :  { %774 = vrot.lane.b32.xlu1 %v772_v58, %s1384_s2 }
 0xf4a   :  { %v775_v59 = vpop.permute.xlu1 %774 }
 0xf4b   :  { %v1635_v61 = vadd.f32 %v775_v59, %v767_v8  ;;  %v1128_v59 = vld [vmem:[%s1756_s7] ss:$0 sm:$0xff] }
 0xf4d   :  { %1338 = vtanh.f32 %v1635_v61 }
 0xf5a   :  { %v1339_v62 = vpop.eup %1338 }
 0xf5b   :  { %780 = vrot.lane.b32.xlu0 %v1339_v62, %s1383_s24 }
 0xfcd   :  { %v781_v63 = vpop.permute.xlu0 %780 }
 0xfce   :  { %v783_v1 = vmul.f32 %v1629_v57, %v781_v63 }
 0xfd0   :  { %791 = vrot.lane.b32.xlu1 %v783_v1, %s1383_s24 }
0x1042   :  { %v792_v3 = vpop.permute.xlu1 %791 }
0x1043   :  { %794 = vst.msk [vmem:[#allocation3 + $0x5] sm:$0x1] %vm48_vm1, %v792_v3  ;;  %1260 = vmatmul.mubr.msk.f32.vlgmr.msra.gmra.mxu1 %vm144_vm3, %v792_v3 }
0x1044   :  { %1281 = vmatprep.mubr.msk.f32.mxu1 %vm1382_vm0, %v1381_v0  ;;  %1274 = vmatpush3.msra.mxu1 %v1018_v49 }
0x1045   :  { %1275 = vmatprep.subr.mxu1 %v1381_v0 }
0x1046   :  { %1276 = vmatpush3.msra.mxu1 %v1017_v50 }
0x1047   :  { %1277 = vmatprep.subr.mxu1 %v1381_v0 }
0x1103   :  { %v864_v9 = vpop.f32.mrf.mxu1 }
0x1104   :  { %v865_v10 = vadd.f32 %v864_v9, %v795_v6 }
0x1105   :  { %v1261_v11 = vpop.f32.mrf.mxu1 }
0x1106   :  { %1340 = vtanh.f32 %v865_v10  ;;  %v1125_v13 = vmul.f32 -1.442695, %v865_v10 }
0x1108   :  { %1342 = vpow2.f32 %v1125_v13 }
0x1113   :  { %v1341_v12 = vpop.eup %1340 }
0x1114   :  { %877 = vrot.lane.b32.xlu0 %v1341_v12, %s1383_s24 }
0x1115   :  { %v1343_v14 = vpop.eup %1342 }
0x1116   :  { %v871_v15 = vadd.f32 1.0, %v1343_v14 }
0x1118   :  { %1344 = vrcp.f32 %v871_v15 }
0x1125   :  { %v1646_v16 = vpop.eup %1344 }
0x1126   :  { %v875_v20 = vmul.f32 %v1646_v16, %v1635_v61 }
0x1186   :  { %v878_v17 = vpop.permute.xlu0 %877 }
0x1187   :  { %v880_v18 = vmul.f32 %v1646_v16, %v878_v17 }
0x1189   :  { %882 = vrot.lane.b32.xlu1 %v880_v18, %s1384_s2 }
0x11fb   :  { %v883_v21 = vpop.permute.xlu1 %882 }
0x11fc   :  { %v885_v22 = vadd.f32 %v883_v21, %v875_v20 }
0x11fe   :  { %1346 = vtanh.f32 %v885_v22 }
0x120b   :  { %v1347_v24 = vpop.eup %1346 }
0x120c   :  { %888 = vrot.lane.b32.xlu0 %v1347_v24, %s1383_s24 }
0x127e   :  { %v889_v26 = vpop.permute.xlu0 %888 }
0x127f   :  { %v891_v27 = vmul.f32 %v1646_v16, %v889_v26 }
0x1281   :  { %899 = vrot.lane.b32.xlu1 %v891_v27, %s1383_s24 }
0x12f3   :  { %v900_v28 = vpop.permute.xlu1 %899 }
0x12f4   :  { %902 = vst.msk [vmem:[#allocation3 + $0x6] sm:$0x1] %vm48_vm1, %v900_v28  ;;  %1271 = vmatmul.mubr.msk.f32.vlgmr.msra.gmra.mxu0 %vm144_vm3, %v900_v28 }
0x13b4   :  { %v972_v31 = vpop.f32.mrf.mxu0 }
0x13b5   :  { %v973_v32 = vadd.f32 %v972_v31, %v903_v30 }
0x13b6   :  { %v1272_v33 = vpop.f32.mrf.mxu0 }
0x13b7   :  { %1348 = vtanh.f32 %v973_v32  ;;  %v1127_v35 = vmul.f32 -1.442695, %v973_v32 }
0x13b9   :  { %1350 = vpow2.f32 %v1127_v35 }
0x13c4   :  { %v1349_v34 = vpop.eup %1348 }
0x13c5   :  { %985 = vrot.lane.b32.xlu0 %v1349_v34, %s1383_s24 }
0x13c6   :  { %v1351_v36 = vpop.eup %1350 }
0x13c7   :  { %v979_v37 = vadd.f32 1.0, %v1351_v36 }
0x13c9   :  { %1352 = vrcp.f32 %v979_v37 }
0x13d6   :  { %v1658_v38 = vpop.eup %1352 }
0x13d7   :  { %v983_v43 = vmul.f32 %v1658_v38, %v885_v22 }
0x1437   :  { %v986_v40 = vpop.permute.xlu0 %985 }
0x1438   :  { %v988_v41 = vmul.f32 %v1658_v38, %v986_v40 }
0x143a   :  { %990 = vrot.lane.b32.xlu1 %v988_v41, %s1384_s2 }
0x14ac   :  { %v991_v44 = vpop.permute.xlu1 %990 }
0x14ad   :  { %v993_v46 = vadd.f32 %v991_v44, %v983_v43 }
0x14af   :  { %1354 = vtanh.f32 %v993_v46  ;;  %1012 = vst.msk [vmem:[#allocation5] sm:$0x1] %vm48_vm1, %v993_v46 }
0x14bc   :  { %v1355_v48 = vpop.eup %1354 }
0x14bd   :  { %996 = vrot.lane.b32.xlu0 %v1355_v48, %s1383_s24 }
0x14c1   :  { %243 = vrot.lane.b32.xlu0 %v1511_v29, %s1384_s2  ;;  %v1016_v29 = vld [vmem:[%s1755_s6 + $0x8] sm:$0xff] }
0x14c2   :  { %1278 = vmatpush3.msra.mxu1 %v1016_v29 }
0x14c3   :  { %1279 = vmatprep.subr.mxu1 %v1381_v0 }
0x14c5   :  { %461 = vrot.lane.b32.xlu0 %v1561_v2, %s1384_s2  ;;  %v1015_v2 = vld [vmem:[%s1755_s6] sm:$0xff] }
0x14c6   :  { %1280 = vmatpush3.msra.mxu1 %v1015_v2 }
0x14c9   :  { %677 = vrot.lane.b32.xlu0 %v1611_v45, %s1384_s2 }
0x14cd   :  { %893 = vrot.lane.b32.xlu0 %v885_v22, %s1384_s2 }
0x152f   :  { %v997_v45 = vpop.permute.xlu0 %996 }
0x1530   :  { %v999_v51 = vmul.f32 %v1658_v38, %v997_v45 }
0x1532   :  { %1007 = vrot.lane.b32.xlu1 %v999_v51, %s1383_s24 }
0x1533   :  { %v244_v52 = vpop.permute.xlu0 %243 }
0x1534   :  { %v247_v53 = vsel %vm246_vm4, %v1506_v23, %v244_v52 }
0x1535   :  { %248 = vst [vmem:[%s1757_s8] sm:$0x1] %v247_v53 }
0x1536   :  { %353 = vrot.lane.b32.xlu1 %v1536_v47, %s1384_s2 }
0x1537   :  { %v462_v54 = vpop.permute.xlu0 %461 }
0x1538   :  { %v464_v0 = vsel %vm246_vm4, %v1555_v60, %v462_v54 }
0x1539   :  { %465 = vst [vmem:[%s1757_s8 + $0x2] sm:$0x1] %v464_v0 }
0x153a   :  { %569 = vrot.lane.b32.xlu1 %v1586_v25, %s1384_s2 }
0x153b   :  { %v678_v4 = vpop.permute.xlu0 %677 }
0x153c   :  { %v680_v23 = vsel %vm246_vm4, %v1605_v39, %v678_v4 }
0x153d   :  { %681 = vst [vmem:[%s1757_s8 + $0x4] sm:$0x1] %v680_v23 }
0x153e   :  { %785 = vrot.lane.b32.xlu1 %v1635_v61, %s1384_s2 }
0x153f   :  { %v894_v47 = vpop.permute.xlu0 %893 }
0x1540   :  { %v896_v60 = vsel %vm246_vm4, %v1646_v16, %v894_v47 }
0x1541   :  { %897 = vst [vmem:[%s1757_s8 + $0x6] sm:$0x1] %v896_v60 }
0x1542   :  { %1001 = vrot.lane.b32.xlu1 %v993_v46, %s1384_s2  ;;  %s1385_s2 = smov 32  }
0x15a4   :  { %v1008_v25 = vpop.permute.xlu1 %1007 }
0x15a5   :  { %1010 = vst.msk [vmem:[#allocation3 + $0x7] sm:$0x1] %vm48_vm1, %v1008_v25  ;;  %1011 = vst.msk [vmem:[#allocation4] sm:$0x1] %vm48_vm1, %v1008_v25 }
0x15a8   :  { %v354_v39 = vpop.permute.xlu1 %353 }
0x15a9   :  { %v356_v55 = vsel %vm246_vm4, %v1530_v42, %v354_v39 }
0x15aa   :  { %357 = vst [vmem:[%s1757_s8 + $0x1] sm:$0x1] %v356_v55 }
0x15ac   :  { %v570_v56 = vpop.permute.xlu1 %569  ;;  %v1013_v5 = vld [vmem:[#allocation3] sm:$0xff] }
0x15ad   :  { %v572_v7 = vsel %vm246_vm4, %v1580_v19, %v570_v56  ;;  %1282 = vmatmul.mubr.msk.f32.vlgmr.msra.gmra.mxu1 %vm144_vm3, %v1013_v5  ;;  %1014 = vst.msk [vmem:[%s1757_s8 + $0x8] sm:$0xff] %vm144_vm3, %v1013_v5 }
0x15ae   :  { %573 = vst [vmem:[%s1757_s8 + $0x3] sm:$0x1] %v572_v7 }
0x15b0   :  { %v786_v42 = vpop.permute.xlu1 %785 }
0x15b1   :  { %v788_v58 = vsel %vm246_vm4, %v1629_v57, %v786_v42 }
0x15b2   :  { %789 = vst [vmem:[%s1757_s8 + $0x5] sm:$0x1] %v788_v58 }
0x15b4   :  { %v1002_v19 = vpop.permute.xlu1 %1001 }
0x15b5   :  { %v1004_v8 = vsel %vm246_vm4, %v1658_v38, %v1002_v19 }
0x15b6   :  { %1005 = vst [vmem:[%s1757_s8 + $0x7] sm:$0x1] %v1004_v8 }
0x166d   :  { %v1095_v61 = vpop.f32.mrf.mxu1 }
0x166e   :  { %v1096_v62 = vadd.f32 %v1128_v59, %v1095_v61 }
0x166f   :  { %v1283_v63 = vpop.f32.mrf.mxu1 }
0x1670   :  { %1100 = vrot.lane.b32.xlu0 %v1096_v62, %s1385_s2 }
0x16e2   :  { %v1101_v57 = vpop.permute.xlu0 %1100 }
0x16e3   :  { %1104 = vst.msk [vmem:[%s1757_s8 + $0x8] sm:$0xff] %vm1103_vm5, %v1101_v57 }
0x16e4   :  { %1109 = vsyncpa [#allocation7], 1 }

</bundles_post_ra>
